<compile_context>
chip_gen: v6e
topology: v6e:2x2x1
jax: 0.10.0
libtpu: 0.0.40
codegen_flags: <defaults>
</compile_context>

<pallas_src>
import functools

import jax
import jax.numpy as jnp
import numpy as np
from jax.experimental import pallas as pl
from jax.experimental.pallas import tpu as pltpu

_LANES = 128


def _round_up(x, m):
    return ((x + m - 1) // m) * m


def _vmem_budget_bytes():
    """Return (tile budget, vmem_limit_bytes) keyed on the TPU generation."""
    cap = None
    try:
        cap = int(getattr(pltpu.get_tpu_info(), "vmem_capacity_bytes", 0)) or None
    except Exception:
        cap = None
    if cap is not None and cap >= (100 << 20):
        # v5e / v6e: 128 MiB physical VMEM per TensorCore -> use most of it.
        return 56 << 20, 96 << 20
    # v7x (64 MiB per TensorCore) or unknown generation: stay conservative.
    return 24 << 20, 32 << 20


def _choose_tile_n(d, itemsize, budget_bytes, max_tile=8192):
    """Largest row tile (multiple of 128) whose double-buffered set fits."""
    d_pad = _round_up(d, _LANES)                    # VMEM lane-pads the minor dim
    per_row = (2 * 2 * d_pad * itemsize             # x1, x2 : 2 inputs x 2 pipeline bufs
               + 2 * 8 * 4)                         # lane-dense f32 label block (8 sublanes) x 2
    tile = (budget_bytes - (64 << 10)) // per_row   # small slack for out blocks / scratch
    tile = min(max_tile, (tile // _LANES) * _LANES)
    return max(tile, _LANES)


def _kl_hinge_kernel(y_ref, x1_ref, x2_ref, out_ref, *, margin, n_rows, tile_n):
    """One row-tile of the contrastive KL loss.

    y_ref  : (1, tile_n)   labels in {+1, -1}, lane-dense (garbage past n_rows)
    x1_ref : (tile_n, D)   distribution P rows
    x2_ref : (tile_n, D)   distribution Q rows
    out_ref: (1, 8, 128)   this tile's partial sum, broadcast (lane-dense store)
    """
    i = pl.program_id(0)
    row0 = i * tile_n

    x1 = x1_ref[...].astype(jnp.float32)
    x2 = x2_ref[...].astype(jnp.float32)

    log_ratio = jnp.log(x1 / x2)                                   # log(P/Q)
    s1 = jnp.sum(x1 * log_ratio, axis=-1, keepdims=True)           # (tile_n,1)  KL(P||Q)
    s2 = jnp.sum(x2 * log_ratio, axis=-1, keepdims=True)           # (tile_n,1) -KL(Q||P)

    # Neutralize NaN/Inf from garbage tail rows of the last (ragged) tile.
    # Cheap: selects on (tile_n, 1) columns, not on the (tile_n, D) inputs.
    valid_col = (row0 + jax.lax.broadcasted_iota(jnp.int32, (tile_n, 1), 0)) < n_rows
    kl12 = jnp.where(valid_col, s1, 0.0)
    kl21 = jnp.where(valid_col, -s2, 0.0)                          # negate the small tensor

    pos_term = kl12 + kl21                                         # y == +1 branch
    neg_term = (jnp.maximum(margin - kl12, 0.0)
                + jnp.maximum(margin - kl21, 0.0))                 # y == -1 branch

    # Lane-oriented selection weights; validity folded in so padded tail rows
    # contribute exactly 0 (their kl terms are already finite from the selects
    # above, so 0 * term stays 0 inside the dot product).
    y = y_ref[...].astype(jnp.float32)                             # (1, tile_n)
    valid_lane = (row0 + jax.lax.broadcasted_iota(jnp.int32, (1, tile_n), 1)) < n_rows
    is_pos = y == 1.0
    w_pos = jnp.where(jnp.logical_and(is_pos, valid_lane), 1.0, 0.0)
    w_neg = jnp.where(jnp.logical_and(jnp.logical_not(is_pos), valid_lane), 1.0, 0.0)

    # Combine lane-major weights with sublane-major per-row terms on the
    # otherwise-idle MXU: (1, tile_n) @ (tile_n, 1) dot products. HIGHEST
    # precision keeps full f32 accuracy for the f32 matmul.
    partial = jnp.sum(
        jnp.dot(w_pos, pos_term, precision=jax.lax.Precision.HIGHEST,
                preferred_element_type=jnp.float32)
        + jnp.dot(w_neg, neg_term, precision=jax.lax.Precision.HIGHEST,
                  preferred_element_type=jnp.float32))

    # Lane-dense unmasked store of this tile's partial sum.
    out_ref[...] = jnp.broadcast_to(partial, (1, 8, 128)).astype(jnp.float32)


def kl_loss(input1, input2, y, *, margin=1.0, avg=True, tile_n=None):
    """Scalar f32 loss equal to KLLoss(margin, avg).forward(input1, input2, y).

    tile_n (rows per grid step) is chosen automatically from the chip's VMEM
    size; if given explicitly it is clamped/rounded to a legal value (a
    multiple of 128, or the full row count).
    """
    n, d = input1.shape
    assert input2.shape == (n, d), "input1/input2 shape mismatch"
    assert y.shape[0] == n and y.size == n, "label count must match number of rows"

    y_row = y.reshape(1, n)          # metadata-only reshape -> lane-dense label DMA

    itemsize = jnp.dtype(input1.dtype).itemsize
    budget, vmem_limit = _vmem_budget_bytes()
    if tile_n is None:
        tile_n = _choose_tile_n(d, itemsize, budget)
    # Keep at least 2 grid steps when there is enough work, so the "parallel"
    # grid axis can occupy both v7x TensorCores (and bound tail imbalance).
    if n > 2 * _LANES:
        tile_n = min(tile_n, _round_up(-(-n // 2), _LANES))
    # Legality of the lane-dense (1, tile_n) label block: tile_n must be a
    # multiple of 128, or the block must span the full row extent.
    if tile_n >= n:
        tile_n = n
    else:
        tile_n = max(_LANES, (tile_n // _LANES) * _LANES)
        if tile_n >= n:
            tile_n = n
    num_tiles = pl.cdiv(n, tile_n)

    kernel = functools.partial(_kl_hinge_kernel, margin=float(margin),
                               n_rows=n, tile_n=tile_n)

    partials = pl.pallas_call(
        kernel,
        out_shape=jax.ShapeDtypeStruct((num_tiles, 8, 128), jnp.float32),
        grid_spec=pltpu.PrefetchScalarGridSpec(
            num_scalar_prefetch=0,
            grid=(num_tiles,),
            in_specs=[pl.BlockSpec((1, tile_n), lambda i: (0, i)),     # labels, lane-dense
                      pl.BlockSpec((tile_n, d), lambda i: (i, 0)),     # P rows
                      pl.BlockSpec((tile_n, d), lambda i: (i, 0))],    # Q rows
            out_specs=pl.BlockSpec((1, 8, 128), lambda i: (i, 0, 0)),
        ),
        compiler_params=pltpu.CompilerParams(
            dimension_semantics=("parallel",),
            vmem_limit_bytes=vmem_limit,
        ),
    )(y_row, input1, input2)

    total = jnp.sum(partials[:, 0, 0])
    if avg:
        total = total / jnp.float32(n)   # HingeEmbeddingLoss 'mean' over all N rows
    return total


def _reference(x1, x2, y, margin=1.0, avg=True):
    x1 = np.asarray(x1, np.float64)
    x2 = np.asarray(x2, np.float64)
    y = np.asarray(y, np.float64)
    kl12 = (x1 * np.log(x1 / x2)).sum(-1)
    kl21 = (x2 * np.log(x2 / x1)).sum(-1)

    def hinge(x):
        return np.where(y == 1, x, np.maximum(margin - x, 0.0))

    h1, h2 = hinge(kl12), hinge(kl21)
    if avg:
        return h1.mean() + h2.mean()
    return h1.sum() + h2.sum()


if __name__ == "__main__":
    key = jax.random.PRNGKey(0)

    # --- case 1: small batch, single full-extent tile (margin=1, avg=True) ---
    N, D = 16, 32
    k1, k2, k3, key = jax.random.split(key, 4)
    p = jax.nn.softmax(jax.random.normal(k1, (N, D), jnp.float32), axis=-1)
    q = jax.nn.softmax(jax.random.normal(k2, (N, D), jnp.float32), axis=-1)
    y = jnp.where(jax.random.bernoulli(k3, 0.5, (N,)), 1.0, -1.0).astype(jnp.float32)

    out1 = jax.block_until_ready(kl_loss(p, q, y, margin=1.0, avg=True))
    ref1 = _reference(p, q, y, margin=1.0, avg=True)
    np.testing.assert_allclose(np.asarray(out1), ref1, rtol=5e-5, atol=1e-5)

    # --- case 2: ragged multi-tile path (3 tiles of 128 rows, 44-row tail) ---
    N2, D2 = 300, 64
    k4, k5, k6, key = jax.random.split(key, 4)
    p2 = jax.nn.softmax(jax.random.normal(k4, (N2, D2), jnp.float32), axis=-1)
    q2 = jax.nn.softmax(jax.random.normal(k5, (N2, D2), jnp.float32), axis=-1)
    y2 = jnp.where(jax.random.bernoulli(k6, 0.5, (N2,)), 1.0, -1.0).astype(jnp.float32)

    out2 = jax.block_until_ready(kl_loss(p2, q2, y2, margin=0.5, avg=False, tile_n=128))
    ref2 = _reference(p2, q2, y2, margin=0.5, avg=False)
    np.testing.assert_allclose(np.asarray(out2), ref2, rtol=5e-5, atol=1e-3)

    print("KERNEL_OK")
</pallas_src>

<mosaic_0001>
module attributes {stable_mosaic.version = 11 : i64} {
  func.func @_kl_hinge_kernel(%arg0: i32, %arg1: memref<1x16xf32, #tpu.memory_space<vmem>>, %arg2: memref<16x32xf32, #tpu.memory_space<vmem>>, %arg3: memref<16x32xf32, #tpu.memory_space<vmem>>, %arg4: memref<1x8x128xf32, #tpu.memory_space<vmem>>) attributes {dimension_semantics = [#tpu.dimension_semantics<parallel>], iteration_bounds = array<i64: 1>, scalar_prefetch = 0 : i64, scratch_operands = 0 : i64, tpu.core_type = #tpu.core_type<tc>, window_params = [{transform_indices = @transform_0, window_bounds = array<i64: 1, 16>}, {transform_indices = @transform_1, window_bounds = array<i64: 16, 32>}, {transform_indices = @transform_2, window_bounds = array<i64: 16, 32>}, {transform_indices = @transform_3, window_bounds = array<i64: 1, 8, 128>}]} {
    %c16_i32 = arith.constant 16 : i32
    %0 = arith.muli %arg0, %c16_i32 : i32
    %c0 = arith.constant 0 : index
    %c0_0 = arith.constant 0 : index
    %1 = vector.load %arg2[%c0, %c0_0] : memref<16x32xf32, #tpu.memory_space<vmem>>, vector<16x32xf32>
    %c0_1 = arith.constant 0 : index
    %c0_2 = arith.constant 0 : index
    %2 = vector.load %arg3[%c0_1, %c0_2] : memref<16x32xf32, #tpu.memory_space<vmem>>, vector<16x32xf32>
    %3 = arith.divf %1, %2 : vector<16x32xf32>
    %4 = math.log %3 : vector<16x32xf32>
    %5 = arith.mulf %1, %4 : vector<16x32xf32>
    %cst = arith.constant dense<0.000000e+00> : vector<16xf32>
    %6 = vector.multi_reduction <add>, %5, %cst [1] : vector<16x32xf32> to vector<16xf32>
    %7 = vector.shape_cast %6 : vector<16xf32> to vector<16x1xf32>
    %8 = arith.mulf %2, %4 : vector<16x32xf32>
    %cst_3 = arith.constant dense<0.000000e+00> : vector<16xf32>
    %9 = vector.multi_reduction <add>, %8, %cst_3 [1] : vector<16x32xf32> to vector<16xf32>
    %10 = vector.shape_cast %9 : vector<16xf32> to vector<16x1xf32>
    %11 = tpu.iota {dimensions = array<i32: 0>} : vector<16x1xi32>
    %12 = vector.broadcast %0 : i32 to vector<16x1xi32>
    %13 = arith.addi %12, %11 : vector<16x1xi32>
    %c16_i32_4 = arith.constant 16 : i32
    %14 = vector.broadcast %c16_i32_4 : i32 to vector<16x1xi32>
    %15 = arith.cmpi slt, %13, %14 : vector<16x1xi32>
    %cst_5 = arith.constant 0.000000e+00 : f32
    %16 = vector.broadcast %cst_5 : f32 to vector<16x1xf32>
    %17 = arith.select %15, %7, %16 : vector<16x1xi1>, vector<16x1xf32>
    %cst_6 = arith.constant 0.000000e+00 : f32
    %18 = vector.broadcast %cst_6 : f32 to vector<16x1xf32>
    %19 = arith.subf %18, %10 : vector<16x1xf32>
    %cst_7 = arith.constant 0.000000e+00 : f32
    %20 = vector.broadcast %cst_7 : f32 to vector<16x1xf32>
    %21 = arith.select %15, %19, %20 : vector<16x1xi1>, vector<16x1xf32>
    %22 = arith.addf %17, %21 : vector<16x1xf32>
    %cst_8 = arith.constant 1.000000e+00 : f32
    %23 = vector.broadcast %cst_8 : f32 to vector<16x1xf32>
    %24 = arith.subf %23, %17 : vector<16x1xf32>
    %cst_9 = arith.constant 0.000000e+00 : f32
    %25 = vector.broadcast %cst_9 : f32 to vector<16x1xf32>
    %26 = arith.maximumf %24, %25 : vector<16x1xf32>
    %cst_10 = arith.constant 1.000000e+00 : f32
    %27 = vector.broadcast %cst_10 : f32 to vector<16x1xf32>
    %28 = arith.subf %27, %21 : vector<16x1xf32>
    %cst_11 = arith.constant 0.000000e+00 : f32
    %29 = vector.broadcast %cst_11 : f32 to vector<16x1xf32>
    %30 = arith.maximumf %28, %29 : vector<16x1xf32>
    %31 = arith.addf %26, %30 : vector<16x1xf32>
    %c0_12 = arith.constant 0 : index
    %c0_13 = arith.constant 0 : index
    %32 = vector.load %arg1[%c0_12, %c0_13] : memref<1x16xf32, #tpu.memory_space<vmem>>, vector<1x16xf32>
    %33 = tpu.iota {dimensions = array<i32: 1>} : vector<1x16xi32>
    %34 = vector.broadcast %0 : i32 to vector<1x16xi32>
    %35 = arith.addi %34, %33 : vector<1x16xi32>
    %c16_i32_14 = arith.constant 16 : i32
    %36 = vector.broadcast %c16_i32_14 : i32 to vector<1x16xi32>
    %37 = arith.cmpi slt, %35, %36 : vector<1x16xi32>
    %cst_15 = arith.constant 1.000000e+00 : f32
    %38 = vector.broadcast %cst_15 : f32 to vector<1x16xf32>
    %39 = arith.cmpf oeq, %32, %38 : vector<1x16xf32>
    %40 = arith.andi %39, %37 : vector<1x16xi1>
    %cst_16 = arith.constant 1.000000e+00 : f32
    %cst_17 = arith.constant 0.000000e+00 : f32
    %41 = vector.broadcast %cst_16 : f32 to vector<1x16xf32>
    %42 = vector.broadcast %cst_17 : f32 to vector<1x16xf32>
    %43 = arith.select %40, %41, %42 : vector<1x16xi1>, vector<1x16xf32>
    %cst_18 = arith.constant dense<true> : vector<1x16xi1>
    %44 = arith.xori %39, %cst_18 : vector<1x16xi1>
    %45 = arith.andi %44, %37 : vector<1x16xi1>
    %cst_19 = arith.constant 1.000000e+00 : f32
    %cst_20 = arith.constant 0.000000e+00 : f32
    %46 = vector.broadcast %cst_19 : f32 to vector<1x16xf32>
    %47 = vector.broadcast %cst_20 : f32 to vector<1x16xf32>
    %48 = arith.select %45, %46, %47 : vector<1x16xi1>, vector<1x16xf32>
    %cst_21 = arith.constant dense<0.000000e+00> : vector<1x1xf32>
    %49 = tpu.matmul %43, %22, %cst_21 {dimension_numbers = #tpu.dot_dimension_numbers<[1], [0], [0], [1], [0, 0, 1, 1], [], []>, precision = #tpu.contract_precision<fp32>} : vector<1x16xf32>, vector<16x1xf32>, vector<1x1xf32> -> vector<1x1xf32>
    %cst_22 = arith.constant dense<0.000000e+00> : vector<1x1xf32>
    %50 = tpu.matmul %48, %31, %cst_22 {dimension_numbers = #tpu.dot_dimension_numbers<[1], [0], [0], [1], [0, 0, 1, 1], [], []>, precision = #tpu.contract_precision<fp32>} : vector<1x16xf32>, vector<16x1xf32>, vector<1x1xf32> -> vector<1x1xf32>
    %51 = arith.addf %49, %50 : vector<1x1xf32>
    %52 = vector.shape_cast %51 : vector<1x1xf32> to vector<1x1x1xf32>
    %cst_23 = arith.constant dense<0.000000e+00> : vector<1xf32>
    %53 = vector.multi_reduction <add>, %52, %cst_23 [1, 2] : vector<1x1x1xf32> to vector<1xf32>
    %54 = vector.shape_cast %53 : vector<1xf32> to vector<1x1x1xf32>
    %55 = vector.extract %54[0, 0, 0] : f32 from vector<1x1x1xf32>
    %56 = vector.broadcast %55 : f32 to vector<1x8x128xf32>
    %c0_24 = arith.constant 0 : index
    %c0_25 = arith.constant 0 : index
    %c0_26 = arith.constant 0 : index
    %57 = vector.load %arg4[%c0_24, %c0_25, %c0_26] : memref<1x8x128xf32, #tpu.memory_space<vmem>>, vector<1x8x128xf32>
    tpu.vector_store %arg4[%c0_24, %c0_25, %c0_26], %56 {strides = array<i32>} : memref<1x8x128xf32, #tpu.memory_space<vmem>>, vector<1x8x128xf32>,
    return
  }
  func.func @transform_0(%arg0: i32) -> (i32, i32) {
    %c0_i32 = arith.constant 0 : i32
    %c0_i32_0 = arith.constant 0 : i32
    return %c0_i32, %arg0 : i32, i32
  }
  func.func @transform_1(%arg0: i32) -> (i32, i32) {
    %c0_i32 = arith.constant 0 : i32
    %c0_i32_0 = arith.constant 0 : i32
    return %arg0, %c0_i32 : i32, i32
  }
  func.func @transform_2(%arg0: i32) -> (i32, i32) {
    %c0_i32 = arith.constant 0 : i32
    %c0_i32_0 = arith.constant 0 : i32
    return %arg0, %c0_i32 : i32, i32
  }
  func.func @transform_3(%arg0: i32) -> (i32, i32, i32) {
    %c0_i32 = arith.constant 0 : i32
    %c0_i32_0 = arith.constant 0 : i32
    %c0_i32_1 = arith.constant 0 : i32
    return %arg0, %c0_i32, %c0_i32_0 : i32, i32, i32
  }
}

</mosaic_0001>

<bundles_post_ra>
// kernel: tpu_custom_call.1
= control target key start
LH: loop header
LB: loop body
LE: loop exit
PB: predicated region body
PF: predicated region fallthrough
CT: control target
= control target key end

     0   :  { %8 = vsyncpa [#allocation3], 0  ;;  %s1442_s0 = inlined_call_operand.hbm [shape: f32[1,16], index: 0, kind: input, shape index: {}]   ;;  %s1443_s1 = inlined_call_operand.hbm [shape: f32[16,32], index: 1, kind: input, shape index: {}]   ;;  %s1444_s2 = inlined_call_operand.hbm [shape: f32[16,32], index: 2, kind: input, shape index: {}]   ;;  %s1445_s3 = inlined_call_operand.hbm [shape: f32[1,8,128], index: 3, kind: output, shape index: {}]  }
   0x1   :  { %9 = vsyncpa [#allocation6], 0 }
   0x2   :  { %10 = vsyncpa [#allocation4], 0  ;;  %s1297_s12 = smov [#allocation5]  }
   0x3   :  { %s26_s13 = sshll.u32 %s1297_s12, 4  ;;  %s27_s13 = int_to_ptr.vmem [resolvable:$true] %s26_s13 }
   0x4   :  { %s1219_s14 = scalar_lea.vmem %s27_s13, 256  ;;  %p1224_p1 = scmp.lt.s32.totalorder %s27_s13, %s27_s13 }
   0x5   :  { %p1220_p0 = scmp.ne.s32.totalorder %s27_s13, %s1219_s14  ;;  %p1225_p2 = scmp.lt.s32.totalorder %s1219_s14, %s1219_s14 }
   0x7   :  { %p1226_p3 = por %p1225_p2, %p1224_p1 }
   0x9   :  { %p1227_p4 = pnand %p1226_p3, %p1220_p0 }
   0xb   :  { %1230 = shalt.err (!%p1227_p4)
}
   0xc   :  { %s1298_s15 = smov 128   ;;  %s1299_s16 = smov 8  }
   0xd   :  { %32 = dma.hbm_to_vmem [thread:$0]  %s1443_s1, 256, %s27_s13, [#allocation6], %s1298_s15, %s1298_s15, %s1299_s16  }
   0xe   :  { %s1300_s19 = smov [#allocation2]   ;;  %s1301_s21 = smov [#allocation7]  }
   0xf   :  { %s17_s20 = sshll.u32 %s1300_s19, 4  ;;  %s38_s22 = sshll.u32 %s1301_s21, 4  ;;  %s18_s20 = int_to_ptr.vmem [resolvable:$true] %s17_s20  ;;  %s39_s22 = int_to_ptr.vmem [resolvable:$true] %s38_s22 }
  0x10   :  { %s1239_s23 = scalar_lea.vmem %s18_s20, 16  ;;  %s1243_s24 = scalar_lea.vmem %s18_s20, 32 }
  0x11   :  { %p1240_p5 = scmp.ne.s32.totalorder %s18_s20, %s1239_s23  ;;  %p1244_p6 = scmp.lt.s32.totalorder %s18_s20, %s18_s20 }
  0x12   :  { %p1245_p7 = scmp.lt.s32.totalorder %s1243_s24, %s1239_s23 }
  0x14   :  { %p1246_p8 = por %p1245_p7, %p1244_p6 }
  0x16   :  { %p1247_p9 = pnand %p1246_p8, %p1240_p5 }
  0x18   :  { %1250 = shalt.err (!%p1247_p9)
}
  0x19   :  { %20 = dma.hbm_to_vmem [thread:$0]  %s1442_s0, 16, %s18_s20, [#allocation3]  }
  0x1a   :  { %s1259_s27 = scalar_lea.vmem %s39_s22, 256  ;;  %p1264_p11 = scmp.lt.s32.totalorder %s39_s22, %s39_s22 }
  0x1b   :  { %p1260_p10 = scmp.ne.s32.totalorder %s39_s22, %s1259_s27  ;;  %p1265_p12 = scmp.lt.s32.totalorder %s1259_s27, %s1259_s27 }
  0x1d   :  { %p1266_p13 = por %p1265_p12, %p1264_p11 }
  0x1f   :  { %p1267_p0 = pnand %p1266_p13, %p1260_p10 }
  0x21   :  { %1270 = shalt.err (!%p1267_p0)
}
  0x22   :  { %44 = dma.hbm_to_vmem [thread:$0]  %s1444_s2, 256, %s39_s22, [#allocation6], %s1298_s15, %s1298_s15, %s1299_s16  }
  0x23   :  { %1291 = dma.done.wait [#allocation3], 16  }
  0x24   :  { %1292 = vsyncadd [#allocation3], 4294967280 }
  0x25   :  { %1293 = dma.done.wait [#allocation6], 512  }
  0x26   :  { %1294 = vsyncadd [#allocation6], 4294966784  ;;  %v58_v0 = vld [vmem:[#allocation7 + $0x8] sm:$0xff]  ;;  %v57_v1 = vld [vmem:[#allocation7] sm:$0xff]  ;;  %vm69_vm0 = vcmask 261120   ;;  %v1302_v20 = vmov 0.0   ;;  %v111_v21 = vlaneseq }
  0x27   :  { %1203 = vrcp.f32 %v58_v0  ;;  %v56_v2 = vld [vmem:[#allocation5 + $0x8] sm:$0xff]  ;;  %v55_v3 = vld [vmem:[#allocation5] sm:$0xff]  ;;  %1108 = vmatprep.subr.mxu0 %v1302_v20  ;;  %1115 = vmatprep.subr.mxu1 %v1302_v20  ;;  %vm1303_vm1 = vmmov 0   ;;  %v110_v22 = vld [vmem:[#allocation2] sm:$0x1]  ;;  %vm1304_vm4 = vmmov 1  }
  0x28   :  { %1205 = vrcp.f32 %v57_v1  ;;  %1112 = vmatprep.mubr.msk.f32.mxu0 %vm1303_vm1, %v1302_v20  ;;  %1119 = vmatprep.mubr.msk.f32.mxu1 %vm1303_vm1, %v1302_v20  ;;  %v112_v23 = vand.u32 127, %v111_v21  ;;  %vm115_vm2 = vcmp.eq.f32.partialorder %v110_v22, 1.0  ;;  %vm121_vm7 = vcmask 130048   ;;  %s1305_s0 = smov [#allocation8]  }
  0x29   :  { %vm118_vm5 = vmxor %vm115_vm2, %vm1304_vm4  ;;  %s1056_s2 = sshll.u32 %s1305_s0, 4  ;;  %s1057_s2 = int_to_ptr.vmem [resolvable:$true] %s1056_s2 }
  0x2a   :  { %vm114_vm3 = vcmp.lt.s32.totalorder %v112_v23, 16  ;;  %s1271_s30 = scalar_lea.vmem %s1057_s2, 128  ;;  %p1276_p2 = scmp.lt.s32.totalorder %s1057_s2, %s1057_s2 }
  0x2b   :  { %vm119_vm6 = vmand %vm118_vm5, %vm114_vm3  ;;  %p1272_p1 = scmp.ne.s32.totalorder %s1057_s2, %s1271_s30  ;;  %p1277_p3 = scmp.lt.s32.totalorder %s1271_s30, %s1271_s30 }
  0x2c   :  { %v1344_v24 = vsel %vm119_vm6, 1.0, %v1302_v20  ;;  %vm116_vm8 = vmand %vm115_vm2, %vm114_vm3 }
  0x2d   :  { %v123_v25 = vsel %vm121_vm7, %v1344_v24, 0  ;;  %v1357_v45 = vsel %vm116_vm8, 1.0, %v1302_v20  ;;  %p1278_p4 = por %p1277_p3, %p1276_p2 }
  0x2e   :  { %v1348_v27 = vsub.f32 %v123_v25, %v123_v25  ;;  %v585_v50 = vsel %vm121_vm7, %v1357_v45, 0 }
  0x2f   :  { %v1363_v55 = vsub.f32 %v585_v50, %v585_v50  ;;  %p1279_p5 = pnand %p1278_p4, %p1272_p1 }
  0x30   :  { %v194_v34 = vand.u32 4294901760, %v1348_v27 }
  0x31   :  { %v656_v61 = vand.u32 4294901760, %v1363_v55 }
  0x32   :  { %v195_v42 = vsub.f32 %v1348_v27, %v194_v34 }
  0x34   :  { %v1204_v4 = vpop.eup %1203  ;;  %v196_v48 = vand.u32 4294901760, %v195_v42 }
  0x35   :  { %v1206_v5 = vpop.eup %1205  ;;  %v62_v6 = vmul.f32 %v1204_v4, %v56_v2 }
  0x36   :  { %v60_v7 = vmul.f32 %v1206_v5, %v55_v3 }
  0x37   :  { %1207 = vlog2.f32 %v62_v6 }
  0x38   :  { %1209 = vlog2.f32 %v60_v7 }
  0x44   :  { %v1208_v8 = vpop.eup %1207 }
  0x45   :  { %v1210_v9 = vpop.eup %1209  ;;  %v66_v10 = vmul.f32 0.6931472, %v1208_v8 }
  0x46   :  { %v64_v11 = vmul.f32 0.6931472, %v1210_v9 }
  0x47   :  { %v77_v12 = vmul.f32 %v66_v10, %v58_v0  ;;  %v68_v13 = vmul.f32 %v66_v10, %v56_v2 }
  0x48   :  { %v76_v14 = vmul.f32 %v64_v11, %v57_v1  ;;  %v67_v15 = vmul.f32 %v64_v11, %v55_v3  ;;  %v657_v1 = vsub.f32 %v1363_v55, %v656_v61 }
  0x49   :  { %v81_v16 = vsel %vm69_vm0, %v77_v12, 0.0  ;;  %v73_v18 = vsel %vm69_vm0, %v68_v13, 0.0 }
  0x4a   :  { %82 = vadd.xlane.f32.xlu0 %v81_v16  ;;  %v78_v17 = vsel %vm69_vm0, %v76_v14, 0.0  ;;  %v70_v19 = vsel %vm69_vm0, %v67_v15, 0.0  ;;  %v658_v4 = vand.u32 4294901760, %v657_v1 }
  0x4b   :  { %79 = vadd.xlane.f32.xlu1 %v78_v17 }
  0x4e   :  { %74 = vadd.xlane.f32.xlu0 %v73_v18 }
  0x4f   :  { %71 = vadd.xlane.f32.xlu1 %v70_v19 }
  0xd3   :  { %v83_v26 = vpop.xlane.xlu0 %82 }
  0xd4   :  { %v95_v28 = vsub.f32 0.0, %v83_v26  ;;  %v80_v29 = vpop.xlane.xlu1 %79 }
  0xd5   :  { %v94_v30 = vsub.f32 0.0, %v80_v29 }
  0xd6   :  { %v105_v31 = vsub.f32 1.0, %v95_v28 }
  0xd7   :  { %v104_v32 = vsub.f32 1.0, %v94_v30  ;;  %v75_v33 = vpop.xlane.xlu0 %74 }
  0xd8   :  { %v101_v35 = vsub.f32 1.0, %v75_v33  ;;  %v72_v36 = vpop.xlane.xlu1 %71  ;;  %v107_v39 = vmax.f32 %v105_v31, 0.0  ;;  %v99_v53 = vadd.f32 %v95_v28, %v75_v33 }
  0xd9   :  { %v106_v37 = vmax.f32 %v104_v32, 0.0  ;;  %v100_v38 = vsub.f32 1.0, %v72_v36  ;;  %v98_v57 = vadd.f32 %v94_v30, %v72_v36 }
  0xda   :  { %v103_v40 = vmax.f32 %v101_v35, 0.0  ;;  %v1368_v60 = vand.u32 4294901760, %v99_v53 }
  0xdb   :  { %v102_v41 = vmax.f32 %v100_v38, 0.0  ;;  %v1373_v63 = vand.u32 4294901760, %v98_v57 }
  0xdc   :  { %v109_v43 = vadd.f32 %v107_v39, %v103_v40  ;;  %v694_v0 = vsub.f32 %v99_v53, %v1368_v60 }
  0xdd   :  { %v108_v44 = vadd.f32 %v106_v37, %v102_v41  ;;  %v701_v2 = vsub.f32 %v98_v57, %v1373_v63 }
  0xde   :  { %v154_v46 = vand.u32 4294901760, %v109_v43  ;;  %v695_v3 = vand.u32 4294901760, %v694_v0 }
  0xdf   :  { %v157_v47 = vand.u32 4294901760, %v108_v44  ;;  %v702_v5 = vand.u32 4294901760, %v701_v2 }
  0xe0   :  { %v232_v49 = vsub.f32 %v109_v43, %v154_v46  ;;  %1109 = vmatpush3.msra.mxu0 %v154_v46  ;;  %v696_v6 = vsub.f32 %v694_v0, %v695_v3 }
  0xe1   :  { %v239_v51 = vsub.f32 %v108_v44, %v157_v47  ;;  %1110 = vmatprep.subr.mxu0 %v1302_v20  ;;  %v703_v7 = vsub.f32 %v701_v2, %v702_v5 }
  0xe2   :  { %1111 = vmatpush3.msra.mxu0 %v157_v47  ;;  %v233_v52 = vand.u32 4294901760, %v232_v49  ;;  %v697_v8 = vand.u32 4294901760, %v696_v6 }
  0xe3   :  { %1122 = vmatprep.subr.mxu0 %v1302_v20  ;;  %1113 = vmatmul.mubr.f32.vlgmr.msra.gmra.mxu0 %v196_v48  ;;  %v240_v54 = vand.u32 4294901760, %v239_v51  ;;  %v704_v9 = vand.u32 4294901760, %v703_v7 }
  0xe4   :  { %1123 = vmatpush3.msra.mxu0 %v232_v49  ;;  %1126 = vmatprep.mubr.msk.f32.mxu0 %vm1303_vm1, %v1302_v20  ;;  %v234_v56 = vsub.f32 %v232_v49, %v233_v52 }
  0xe5   :  { %1124 = vmatprep.subr.mxu0 %v1302_v20  ;;  %v241_v58 = vsub.f32 %v239_v51, %v240_v54 }
  0xe6   :  { %1125 = vmatpush3.msra.mxu0 %v239_v51  ;;  %v235_v59 = vand.u32 4294901760, %v234_v56 }
  0xe7   :  { %1136 = vmatprep.subr.mxu0 %v1302_v20  ;;  %1127 = vmatmul.mubr.f32.vlgmr.msra.gmra.mxu0 %v1348_v27  ;;  %v242_v62 = vand.u32 4294901760, %v241_v58 }
  0xe8   :  { %1116 = vmatpush3.msra.mxu1 %v235_v59  ;;  %1137 = vmatpush3.msra.mxu0 %v233_v52 }
  0xe9   :  { %1117 = vmatprep.subr.mxu1 %v1302_v20  ;;  %1138 = vmatprep.subr.mxu0 %v1302_v20 }
  0xea   :  { %1118 = vmatpush3.msra.mxu1 %v242_v62  ;;  %1139 = vmatpush3.msra.mxu0 %v240_v54 }
  0xeb   :  { %1120 = vmatmul.mubr.msk.f32.vlgmr.msra.gmra.mxu1 %vm121_vm7, %v1344_v24  ;;  %1129 = vmatprep.subr.mxu1 %v1302_v20 }
  0xec   :  { %1140 = vmatprep.mubr.msk.f32.mxu0 %vm1303_vm1, %v1302_v20  ;;  %1150 = vmatprep.subr.mxu0 %v1302_v20 }
  0xed   :  { %1130 = vmatpush3.msra.mxu1 %v154_v46  ;;  %1141 = vmatmul.mubr.msk.f32.vlgmr.msra.gmra.mxu0 %vm121_vm7, %v1344_v24 }
  0xee   :  { %1151 = vmatpush3.msra.mxu0 %v1368_v60  ;;  %1131 = vmatprep.subr.mxu1 %v1302_v20 }
  0xef   :  { %1152 = vmatprep.subr.mxu0 %v1302_v20  ;;  %1132 = vmatpush3.msra.mxu1 %v157_v47 }
  0xf0   :  { %1133 = vmatprep.mubr.msk.f32.mxu1 %vm1303_vm1, %v1302_v20  ;;  %1153 = vmatpush3.msra.mxu0 %v1373_v63 }
  0xf1   :  { %1134 = vmatmul.mubr.f32.vlgmr.msra.gmra.mxu1 %v194_v34  ;;  %1143 = vmatprep.subr.mxu1 %v1302_v20 }
  0xf2   :  { %1154 = vmatprep.mubr.msk.f32.mxu0 %vm1303_vm1, %v1302_v20  ;;  %1164 = vmatprep.subr.mxu0 %v1302_v20 }
  0xf3   :  { %1144 = vmatpush3.msra.mxu1 %v154_v46  ;;  %1155 = vmatmul.mubr.f32.vlgmr.msra.gmra.mxu0 %v658_v4 }
  0xf4   :  { %1165 = vmatpush3.msra.mxu0 %v694_v0  ;;  %1145 = vmatprep.subr.mxu1 %v1302_v20 }
  0xf5   :  { %1166 = vmatprep.subr.mxu0 %v1302_v20  ;;  %1146 = vmatpush3.msra.mxu1 %v157_v47 }
  0xf6   :  { %1147 = vmatprep.mubr.msk.f32.mxu1 %vm1303_vm1, %v1302_v20  ;;  %1167 = vmatpush3.msra.mxu0 %v701_v2 }
  0xf7   :  { %1148 = vmatmul.mubr.msk.f32.vlgmr.msra.gmra.mxu1 %vm121_vm7, %v1344_v24  ;;  %1157 = vmatprep.subr.mxu1 %v1302_v20 }
  0xf8   :  { %1168 = vmatprep.mubr.msk.f32.mxu0 %vm1303_vm1, %v1302_v20  ;;  %1178 = vmatprep.subr.mxu0 %v1302_v20 }
  0xf9   :  { %1158 = vmatpush3.msra.mxu1 %v697_v8  ;;  %1169 = vmatmul.mubr.f32.vlgmr.msra.gmra.mxu0 %v1363_v55 }
  0xfa   :  { %1179 = vmatpush3.msra.mxu0 %v695_v3  ;;  %1159 = vmatprep.subr.mxu1 %v1302_v20 }
  0xfb   :  { %1180 = vmatprep.subr.mxu0 %v1302_v20  ;;  %1160 = vmatpush3.msra.mxu1 %v704_v9 }
  0xfc   :  { %1161 = vmatprep.mubr.msk.f32.mxu1 %vm1303_vm1, %v1302_v20  ;;  %1181 = vmatpush3.msra.mxu0 %v702_v5 }
  0xfd   :  { %1162 = vmatmul.mubr.msk.f32.vlgmr.msra.gmra.mxu1 %vm121_vm7, %v1357_v45  ;;  %1171 = vmatprep.subr.mxu1 %v1302_v20 }
  0xfe   :  { %1172 = vmatpush3.msra.mxu1 %v1368_v60  ;;  %1175 = vmatprep.mubr.msk.f32.mxu1 %vm1303_vm1, %v1302_v20 }
  0xff   :  { %1173 = vmatprep.subr.mxu1 %v1302_v20  ;;  %1182 = vmatprep.mubr.msk.f32.mxu0 %vm1303_vm1, %v1302_v20 }
 0x100   :  { %1174 = vmatpush3.msra.mxu1 %v1373_v63  ;;  %1183 = vmatmul.mubr.msk.f32.vlgmr.msra.gmra.mxu0 %vm121_vm7, %v1357_v45 }
 0x101   :  { %1176 = vmatmul.mubr.f32.vlgmr.msra.gmra.mxu1 %v656_v61  ;;  %1185 = vmatprep.subr.mxu1 %v1302_v20 }
 0x102   :  { %1186 = vmatpush3.msra.mxu1 %v1368_v60  ;;  %1189 = vmatprep.mubr.msk.f32.mxu1 %vm1303_vm1, %v1302_v20 }
 0x103   :  { %1187 = vmatprep.subr.mxu1 %v1302_v20 }
 0x104   :  { %1188 = vmatpush3.msra.mxu1 %v1373_v63 }
 0x105   :  { %1190 = vmatmul.mubr.msk.f32.vlgmr.msra.gmra.mxu1 %vm121_vm7, %v1357_v45 }
 0x1a3   :  { %v198_v10 = vpop.f32.mrf.mxu0 }
 0x1a5   :  { %v1114_v11 = vpop.f32.mrf.mxu0 }
 0x1a7   :  { %v355_v12 = vpop.f32.mrf.mxu0 }
 0x1a9   :  { %v1128_v13 = vpop.f32.mrf.mxu0 }
 0x1ab   :  { %v279_v14 = vpop.f32.mrf.mxu1 }
 0x1ac   :  { %v280_v15 = vadd.f32 %v279_v14, %v198_v10 }
 0x1ad   :  { %v1121_v16 = vpop.f32.mrf.mxu1  ;;  %v507_v17 = vpop.f32.mrf.mxu0 }
 0x1ae   :  { %v356_v18 = vadd.f32 %v355_v12, %v280_v15 }
 0x1af   :  { %v1142_v19 = vpop.f32.mrf.mxu0 }
 0x1b1   :  { %v430_v21 = vpop.f32.mrf.mxu1 }
 0x1b2   :  { %v431_v22 = vadd.f32 %v430_v21, %v356_v18 }
 0x1b3   :  { %v1135_v23 = vpop.f32.mrf.mxu1  ;;  %v660_v24 = vpop.f32.mrf.mxu0 }
 0x1b4   :  { %v508_v20 = vadd.f32 %v507_v17, %v431_v22 }
 0x1b5   :  { %v1156_v25 = vpop.f32.mrf.mxu0 }
 0x1b7   :  { %v580_v26 = vpop.f32.mrf.mxu1 }
 0x1b8   :  { %v581_v27 = vadd.f32 %v580_v26, %v508_v20 }
 0x1b9   :  { %v1149_v28 = vpop.f32.mrf.mxu1  ;;  %v817_v29 = vpop.f32.mrf.mxu0 }
 0x1ba   :  { %v661_v30 = vadd.f32 %v660_v24, %v581_v27 }
 0x1bb   :  { %v1170_v31 = vpop.f32.mrf.mxu0 }
 0x1bd   :  { %v741_v32 = vpop.f32.mrf.mxu1 }
 0x1be   :  { %v742_v33 = vadd.f32 %v741_v32, %v661_v30 }
 0x1bf   :  { %v1163_v34 = vpop.f32.mrf.mxu1 }
 0x1c0   :  { %v818_v35 = vadd.f32 %v817_v29, %v742_v33  ;;  %v969_v36 = vpop.f32.mrf.mxu0 }
 0x1c1   :  { %v892_v37 = vpop.f32.mrf.mxu1 }
 0x1c2   :  { %v893_v38 = vadd.f32 %v892_v37, %v818_v35  ;;  %v1184_v39 = vpop.f32.mrf.mxu0 }
 0x1c3   :  { %v1177_v40 = vpop.f32.mrf.mxu1 }
 0x1c4   :  { %v970_v41 = vadd.f32 %v969_v36, %v893_v38 }
 0x1c5   :  { %v1042_v42 = vpop.f32.mrf.mxu1 }
 0x1c6   :  { %v1043_v43 = vadd.f32 %v1042_v42, %v970_v41 }
 0x1c7   :  { %v1191_v44 = vpop.f32.mrf.mxu1 }
 0x1c8   :  { %1192 = vpush %v1043_v43 }
 0x1f9   :  { %s1193_s29 = spop %1192 }
 0x1fa   :  { %v1048_v45 = vstv %s1193_s29 }
 0x1fb   :  { %1049 = vst [vmem:[#allocation8] sm:$0xff] %v1048_v45 }
 0x1fc   :  { %1282 = shalt.err (!%p1279_p5)
}
 0x1fd   :  { %1059 = dma.vmem_to_hbm [thread:$0]  %s1057_s2, 128, %s1445_s3, [#allocation4]  }
 0x1fe   :  { %1295 = dma.done.wait [#allocation4], 128  }
 0x1ff   :  { %1296 = vsyncadd [#allocation4], 4294967168 }
 0x200   :  { %1063 = vsyncpa [#allocation3], 1 }
 0x201   :  { %1064 = vsyncpa [#allocation6], 1 }
 0x202   :  { %1065 = vsyncpa [#allocation4], 1 }

</bundles_post_ra>
